<compile_context>
chip_gen: v6e
topology: v6e:2x2x1
jax: 0.10.0
libtpu: 0.0.40
codegen_flags: <defaults>
</compile_context>

<pallas_src>
import functools

import jax
import jax.numpy as jnp
from jax.experimental import pallas as pl
from jax.experimental.pallas import tpu as pltpu

SMOOTHING = 0.1
CONFIDENCE = 1.0 - SMOOTHING


def _ls_ce_kernel(col_ids_ref, x_ref, tgt_ref, out_ref, *, n_valid, w_target, w_other):
    """One (TILE_N, C) row tile -> one per-tile partial loss sum.

    Per row i (equivalent to confidence*nll_i + smoothing*mean_j(-logprob_ij)):
        loss_i = log(sum_j exp(x_ij - m_i)) - sum_j w_ij * (x_ij - m_i)
        w_ij   = smoothing/C + confidence * [j == target_i]   (sum_j w_ij == 1)
    """
    pid = pl.program_id(0)

    x = x_ref[...].astype(jnp.float32)            # (TILE_N, C) f32 working copy
    tn, _ = x.shape
    tgt = tgt_ref[...]                            # (TILE_N, 1) int32
    col_ids = col_ids_ref[...]                    # (1, C) int32, resident block

    m = jnp.max(x, axis=-1, keepdims=True)        # (TILE_N, 1)
    xm = x - m                                    # reused by exp AND weighted sum
    sum_exp = jnp.sum(jnp.exp(xm), axis=-1, keepdims=True)
    w = jnp.where(col_ids == tgt, w_target, w_other)        # (TILE_N, C)
    wsum = jnp.sum(w * xm, axis=-1, keepdims=True)          # (TILE_N, 1)
    loss = jnp.log(sum_exp) - wsum                          # (TILE_N, 1)

    # The last tile may extend past the true batch; its tail rows hold whatever
    # the clipped DMA left in VMEM (possibly Inf/NaN).  A select discards them
    # without propagating NaN into the sum.
    row_ids = pid * tn + jax.lax.broadcasted_iota(jnp.int32, (tn, 1), 0)
    loss = jnp.where(row_ids < n_valid, loss, 0.0)

    partial = jnp.sum(loss)

    # Independent (8,128)-aligned output block per grid step: partial sum at
    # [0, 0], zeros elsewhere.  No shared accumulator -> "parallel" row axis.
    r = jax.lax.broadcasted_iota(jnp.int32, (8, 128), 0)
    c = jax.lax.broadcasted_iota(jnp.int32, (8, 128), 1)
    out_ref[...] = jnp.where((r == 0) & (c == 0), partial, 0.0)


def label_smoothing_cross_entropy(x, target, *, tile_n=None):
    """x: (N, C) float logits (f32 or bf16), target: (N,) int class ids -> scalar loss."""
    n, c = x.shape
    itemsize = jnp.dtype(x.dtype).itemsize

    # Sublane packing granularity for the row dim: f32 -> 8, bf16 -> 16, int8 -> 32.
    gran = max(8, 32 // itemsize)

    # Size the row tile by its true VMEM footprint (lane-padded widths):
    # 2 double-buffered logits slabs + ~3 f32 elementwise temps + thin per-row temps.
    c_pad = -(-c // 128) * 128
    bytes_per_row = (2 * c_pad * itemsize     # double-buffered logits tile
                     + 3 * c_pad * 4          # f32 upcast / exp / weighted temps
                     + 2 * 128 * 4            # double-buffered targets (lane-padded)
                     + 8 * 128 * 4)           # per-row (TILE_N,1) f32 temps
    budget = 24 * 1024 * 1024
    auto_tile = budget // bytes_per_row
    if tile_n is None:
        tile_n = auto_tile
    tile_n = int(min(tile_n, 4096))

    if n < gran:
        tile_n = n                                  # block == full row extent
    else:
        tile_n = max(gran, (tile_n // gran) * gran)
        tile_n = min(tile_n, (n // gran) * gran)    # never exceed the array

    num_tiles = pl.cdiv(n, tile_n)                  # ragged last tile allowed

    col_ids = jnp.arange(c, dtype=jnp.int32).reshape(1, c)
    tgt2d = target.astype(jnp.int32).reshape(n, 1)
    # TODO(synk): out-of-range/negative targets silently fall back to the
    # smoothing-only term instead of raising like PyTorch's gather would.

    w_other = SMOOTHING / c
    w_target = CONFIDENCE + w_other

    kernel = functools.partial(_ls_ce_kernel, n_valid=n,
                               w_target=w_target, w_other=w_other)

    cost = pl.CostEstimate(
        flops=6 * n * c,
        transcendentals=n * c,
        bytes_accessed=n * c * itemsize + n * 4 + c * 4 + num_tiles * 8 * 128 * 4,
    )

    partials = pl.pallas_call(
        kernel,
        out_shape=jax.ShapeDtypeStruct((num_tiles * 8, 128), jnp.float32),
        grid_spec=pltpu.PrefetchScalarGridSpec(
            num_scalar_prefetch=0,
            grid=(num_tiles,),
            in_specs=[
                pl.BlockSpec((1, c), lambda i: (0, 0)),         # resident column ids
                pl.BlockSpec((tile_n, c), lambda i: (i, 0)),    # logits row tile
                pl.BlockSpec((tile_n, 1), lambda i: (i, 0)),    # targets row tile
            ],
            out_specs=pl.BlockSpec((8, 128), lambda i: (i, 0)), # per-tile partial sum
        ),
        compiler_params=pltpu.CompilerParams(
            dimension_semantics=("parallel",),                  # megacore-friendly
            vmem_limit_bytes=48 * 1024 * 1024,
        ),
        cost_estimate=cost,
    )(col_ids, x, tgt2d)

    # Tiny cross-tile reduction + mean in XLA (also avoids a long serial f32
    # accumulation chain for very large N).
    return jnp.sum(partials) / n


def _reference(x, target):
    # Pure-JAX reference mirroring the PyTorch module.
    logprobs = jax.nn.log_softmax(x.astype(jnp.float32), axis=-1)
    nll = -jnp.take_along_axis(logprobs, target[:, None].astype(jnp.int32), axis=-1)[:, 0]
    smooth = -jnp.mean(logprobs, axis=-1)
    return jnp.mean(CONFIDENCE * nll + SMOOTHING * smooth)


if __name__ == "__main__":
    key = jax.random.PRNGKey(0)
    k1, k2, k3, k4 = jax.random.split(key, 4)

    # Clothing1M-like small shape: batch=8 logits over 14 classes, f32.
    N, C = 8, 14
    x = jax.random.normal(k1, (N, C), dtype=jnp.float32)
    target = jax.random.randint(k2, (N,), 0, C, dtype=jnp.int32)
    loss = label_smoothing_cross_entropy(x, target)
    jax.block_until_ready(loss)
    ref = _reference(x, target)
    assert jnp.allclose(loss, ref, atol=1e-5, rtol=1e-5), (loss, ref)

    # Multi-tile ragged path: 72 rows, tile 32 -> grid of 3, clipped last block,
    # bf16 logits kept native in HBM (no host-side padding anywhere).
    N2, C2 = 72, 128
    x2 = jax.random.normal(k3, (N2, C2), dtype=jnp.bfloat16)
    target2 = jax.random.randint(k4, (N2,), 0, C2, dtype=jnp.int32)
    loss2 = label_smoothing_cross_entropy(x2, target2, tile_n=32)
    jax.block_until_ready(loss2)
    ref2 = _reference(x2, target2)
    assert jnp.allclose(loss2, ref2, atol=2e-3, rtol=2e-3), (loss2, ref2)

    print("KERNEL_OK")
</pallas_src>

<mosaic_0001>
module attributes {stable_mosaic.version = 11 : i64} {
  func.func @_ls_ce_kernel(%arg0: i32, %arg1: memref<1x14xi32, #tpu.memory_space<vmem>>, %arg2: memref<8x14xf32, #tpu.memory_space<vmem>>, %arg3: memref<8x1xi32, #tpu.memory_space<vmem>>, %arg4: memref<8x128xf32, #tpu.memory_space<vmem>>) attributes {dimension_semantics = [#tpu.dimension_semantics<parallel>], iteration_bounds = array<i64: 1>, scalar_prefetch = 0 : i64, scratch_operands = 0 : i64, tpu.core_type = #tpu.core_type<tc>, window_params = [{pipeline_mode = #tpu.pipeline_mode<synchronous>, transform_indices = @transform_0, window_bounds = array<i64: 1, 14>}, {transform_indices = @transform_1, window_bounds = array<i64: 8, 14>}, {transform_indices = @transform_2, window_bounds = array<i64: 8, 1>}, {transform_indices = @transform_3, window_bounds = array<i64: 8, 128>}]} {
    %c0 = arith.constant 0 : index
    %c0_0 = arith.constant 0 : index
    %0 = vector.load %arg2[%c0, %c0_0] : memref<8x14xf32, #tpu.memory_space<vmem>>, vector<8x14xf32>
    %c0_1 = arith.constant 0 : index
    %c0_2 = arith.constant 0 : index
    %1 = vector.load %arg3[%c0_1, %c0_2] : memref<8x1xi32, #tpu.memory_space<vmem>>, vector<8x1xi32>
    %c0_3 = arith.constant 0 : index
    %c0_4 = arith.constant 0 : index
    %2 = vector.load %arg1[%c0_3, %c0_4] : memref<1x14xi32, #tpu.memory_space<vmem>>, vector<1x14xi32>
    %cst = arith.constant dense<0xFF800000> : vector<8xf32>
    %3 = vector.multi_reduction <maximumf>, %0, %cst [1] : vector<8x14xf32> to vector<8xf32>
    %4 = vector.shape_cast %3 : vector<8xf32> to vector<8x1xf32>
    %5 = vector.broadcast %4 : vector<8x1xf32> to vector<8x14xf32>
    %6 = arith.subf %0, %5 : vector<8x14xf32>
    %7 = math.exp %6 : vector<8x14xf32>
    %cst_5 = arith.constant dense<0.000000e+00> : vector<8xf32>
    %8 = vector.multi_reduction <add>, %7, %cst_5 [1] : vector<8x14xf32> to vector<8xf32>
    %9 = vector.shape_cast %8 : vector<8xf32> to vector<8x1xf32>
    %10 = vector.broadcast %2 : vector<1x14xi32> to vector<8x14xi32>
    %11 = vector.broadcast %1 : vector<8x1xi32> to vector<8x14xi32>
    %12 = arith.cmpi eq, %10, %11 : vector<8x14xi32>
    %cst_6 = arith.constant 0.907142878 : f32
    %cst_7 = arith.constant 0.00714285718 : f32
    %13 = vector.broadcast %cst_6 : f32 to vector<8x14xf32>
    %14 = vector.broadcast %cst_7 : f32 to vector<8x14xf32>
    %15 = arith.select %12, %13, %14 : vector<8x14xi1>, vector<8x14xf32>
    %16 = arith.mulf %15, %6 : vector<8x14xf32>
    %cst_8 = arith.constant dense<0.000000e+00> : vector<8xf32>
    %17 = vector.multi_reduction <add>, %16, %cst_8 [1] : vector<8x14xf32> to vector<8xf32>
    %18 = vector.shape_cast %17 : vector<8xf32> to vector<8x1xf32>
    %19 = math.log %9 : vector<8x1xf32>
    %20 = arith.subf %19, %18 : vector<8x1xf32>
    %c8_i32 = arith.constant 8 : i32
    %21 = arith.muli %arg0, %c8_i32 : i32
    %22 = tpu.iota {dimensions = array<i32: 0>} : vector<8x1xi32>
    %23 = vector.broadcast %21 : i32 to vector<8x1xi32>
    %24 = arith.addi %23, %22 : vector<8x1xi32>
    %c8_i32_9 = arith.constant 8 : i32
    %25 = vector.broadcast %c8_i32_9 : i32 to vector<8x1xi32>
    %26 = arith.cmpi slt, %24, %25 : vector<8x1xi32>
    %cst_10 = arith.constant 0.000000e+00 : f32
    %27 = vector.broadcast %cst_10 : f32 to vector<8x1xf32>
    %28 = arith.select %26, %20, %27 : vector<8x1xi1>, vector<8x1xf32>
    %29 = vector.shape_cast %28 : vector<8x1xf32> to vector<1x8x1xf32>
    %cst_11 = arith.constant dense<0.000000e+00> : vector<1xf32>
    %30 = vector.multi_reduction <add>, %29, %cst_11 [1, 2] : vector<1x8x1xf32> to vector<1xf32>
    %31 = vector.shape_cast %30 : vector<1xf32> to vector<1x1x1xf32>
    %32 = vector.extract %31[0, 0, 0] : f32 from vector<1x1x1xf32>
    %33 = tpu.iota {dimensions = array<i32: 0>} : vector<8x128xi32>
    %34 = tpu.iota {dimensions = array<i32: 1>} : vector<8x128xi32>
    %c0_i32 = arith.constant 0 : i32
    %35 = vector.broadcast %c0_i32 : i32 to vector<8x128xi32>
    %36 = arith.cmpi eq, %33, %35 : vector<8x128xi32>
    %c0_i32_12 = arith.constant 0 : i32
    %37 = vector.broadcast %c0_i32_12 : i32 to vector<8x128xi32>
    %38 = arith.cmpi eq, %34, %37 : vector<8x128xi32>
    %39 = arith.andi %36, %38 : vector<8x128xi1>
    %cst_13 = arith.constant 0.000000e+00 : f32
    %40 = vector.broadcast %32 : f32 to vector<8x128xf32>
    %41 = vector.broadcast %cst_13 : f32 to vector<8x128xf32>
    %42 = arith.select %39, %40, %41 : vector<8x128xi1>, vector<8x128xf32>
    %c0_14 = arith.constant 0 : index
    %c0_15 = arith.constant 0 : index
    %43 = vector.load %arg4[%c0_14, %c0_15] : memref<8x128xf32, #tpu.memory_space<vmem>>, vector<8x128xf32>
    tpu.vector_store %arg4[%c0_14, %c0_15], %42 {strides = array<i32>} : memref<8x128xf32, #tpu.memory_space<vmem>>, vector<8x128xf32>,
    return
  }
  func.func @transform_0(%arg0: i32) -> (i32, i32) {
    %c0_i32 = arith.constant 0 : i32
    %c0_i32_0 = arith.constant 0 : i32
    %c0_i32_1 = arith.constant 0 : i32
    return %c0_i32, %c0_i32_0 : i32, i32
  }
  func.func @transform_1(%arg0: i32) -> (i32, i32) {
    %c0_i32 = arith.constant 0 : i32
    %c0_i32_0 = arith.constant 0 : i32
    return %arg0, %c0_i32 : i32, i32
  }
  func.func @transform_2(%arg0: i32) -> (i32, i32) {
    %c0_i32 = arith.constant 0 : i32
    %c0_i32_0 = arith.constant 0 : i32
    return %arg0, %c0_i32 : i32, i32
  }
  func.func @transform_3(%arg0: i32) -> (i32, i32) {
    %c0_i32 = arith.constant 0 : i32
    %c0_i32_0 = arith.constant 0 : i32
    return %arg0, %c0_i32 : i32, i32
  }
}

</mosaic_0001>

<bundles_post_ra>
// kernel: tpu_custom_call.1
= control target key start
LH: loop header
LB: loop body
LE: loop exit
PB: predicated region body
PF: predicated region fallthrough
CT: control target
= control target key end

     0   :  { %vm18_vm0 = vcmask 113664   ;;  %s155_s0 = inlined_call_operand.vmem [shape: s32[1,14], index: 0, kind: input, shape index: {}]   ;;  %s156_s1 = inlined_call_operand.vmem [shape: f32[8,14], index: 1, kind: input, shape index: {}]   ;;  %s157_s2 = inlined_call_operand.vmem [shape: s32[8,1], index: 2, kind: input, shape index: {}]   ;;  %s158_s3 = inlined_call_operand.hbm [shape: f32[8,128], index: 3, kind: output, shape index: {}]  }
   0x1   :  { %v15_v0 = vld [vmem:[%s156_s1] sm:$0xff] }
   0x2   :  { %8 = vsyncpa [#allocation3], 0  ;;  %v19_v1 = vsel %vm18_vm0, %v15_v0, -inf  ;;  %v117_v2 = vmov 0   ;;  %v16_v3 = vld [vmem:[%s157_s2] sm:$0xff]  ;;  %vm51_vm2 = vcmask 7168   ;;  %v45_v28 = vlaneseq }
   0x3   :  { %90 = vset.pattern.permute.xlu0 %v117_v2  ;;  %v84_v7 = vld [vmem:[%s155_s0] ss:$0 sm:$0xff]  ;;  %v118_v9 = vmov 0.007142857   ;;  %s119_s0 = smov [#allocation2]  }
   0x4   :  { %20 = vmax.xlane.f32.xlu0 %v19_v1  ;;  %v46_v29 = vshrl.u32 %v45_v28, 7  ;;  %v63_v30 = vand.u32 127, %v45_v28  ;;  %s76_s1 = sshll.u32 %s119_s0, 4  ;;  %s77_s1 = int_to_ptr.vmem [resolvable:$true] %s76_s1 }
   0x5   :  { %s95_s18 = scalar_lea.vmem %s77_s1, 128  ;;  %p100_p1 = scmp.lt.s32.totalorder %s77_s1, %s77_s1 }
   0x6   :  { %vm64_vm3 = vcmp.eq.s32.totalorder %v46_v29, 0  ;;  %vm65_vm4 = vcmp.eq.s32.totalorder %v63_v30, 0  ;;  %p96_p0 = scmp.ne.s32.totalorder %s77_s1, %s95_s18  ;;  %p101_p2 = scmp.lt.s32.totalorder %s95_s18, %s95_s18 }
   0x7   :  { %vm66_vm5 = vmand %vm64_vm3, %vm65_vm4 }
   0x8   :  { %p102_p3 = por %p101_p2, %p100_p1 }
   0xa   :  { %p103_p4 = pnand %p102_p3, %p96_p0 }
  0x1a   :  { %33 = vperm.xlu0 %90, %v16_v3  }
  0x8d   :  { %v21_v4 = vpop.xlane.xlu0 %20 }
  0x8e   :  { %v22_v5 = vsub.f32 %v15_v0, %v21_v4 }
  0x90   :  { %v23_v6 = vmul.f32 1.442695, %v22_v5 }
  0x92   :  { %91 = vpow2.f32 %v23_v6 }
  0x95   :  { %v34_v8 = vpop.permute.xlu0 %33 }
  0x96   :  { %vm35_vm1 = vcmp.eq.s32.totalorder %v84_v7, %v34_v8 }
  0x97   :  { %v36_v10 = vsel %vm35_vm1, 0.9071429, %v118_v9 }
  0x98   :  { %v37_v13 = vmul.f32 %v36_v10, %v22_v5 }
  0x9a   :  { %v38_v14 = vsel %vm18_vm0, %v37_v13, 0.0 }
  0x9f   :  { %v92_v11 = vpop.eup %91 }
  0xa0   :  { %v25_v12 = vsel %vm18_vm0, %v92_v11, 0.0 }
  0xa1   :  { %26 = vadd.xlane.f32.xlu1 %v25_v12 }
  0xa5   :  { %39 = vadd.xlane.f32.xlu1 %v38_v14 }
 0x12a   :  { %v27_v15 = vpop.xlane.xlu1 %26 }
 0x12b   :  { %93 = vlog2.f32 %v27_v15 }
 0x12e   :  { %v40_v18 = vpop.xlane.xlu1 %39 }
 0x138   :  { %v94_v16 = vpop.eup %93 }
 0x139   :  { %v42_v17 = vmul.f32 0.6931472, %v94_v16 }
 0x13b   :  { %v43_v19 = vsub.f32 %v42_v17, %v40_v18 }
 0x13d   :  { %v52_v20 = vsel %vm51_vm2, %v43_v19, 0.0 }
 0x13e   :  { %53 = vadd.xlane.f32.xlu1 %v52_v20 }
 0x1c7   :  { %v54_v21 = vpop.xlane.xlu1 %53 }
 0x1c8   :  { %v55_v22 = vrot.slane %v54_v21, 4 }
 0x1ca   :  { %v56_v23 = vadd.f32 %v55_v22, %v54_v21 }
 0x1cc   :  { %v57_v24 = vrot.slane %v56_v23, 2 }
 0x1ce   :  { %v58_v25 = vadd.f32 %v57_v24, %v56_v23 }
 0x1d0   :  { %v59_v26 = vrot.slane %v58_v25, 1 }
 0x1d2   :  { %v60_v27 = vadd.f32 %v59_v26, %v58_v25 }
 0x1d4   :  { %85 = vpush %v60_v27 }
 0x205   :  { %s86_s2 = spop %85 }
 0x206   :  { %v67_v31 = vstv %s86_s2 }
 0x207   :  { %v68_v32 = vsel %vm66_vm5, %v67_v31, 0.0 }
 0x208   :  { %69 = vst [vmem:[#allocation2] sm:$0xff] %v68_v32 }
 0x209   :  { %106 = shalt.err (!%p103_p4)
}
 0x20a   :  { %79 = dma.vmem_to_hbm [thread:$0]  %s77_s1, 128, %s158_s3, [#allocation3]  }
 0x20b   :  { %115 = dma.done.wait [#allocation3], 128  }
 0x20c   :  { %116 = vsyncadd [#allocation3], 4294967168 }
 0x20d   :  { %83 = vsyncpa [#allocation3], 1 }

</bundles_post_ra>
